<compile_context>
chip_gen: v6e
topology: v6e:2x2x1
jax: 0.10.0
libtpu: 0.0.40
codegen_flags: <defaults>
</compile_context>

<pallas_src>
import jax
import jax.numpy as jnp
from jax.experimental import pallas as pl
from jax.experimental.pallas import tpu as pltpu

HIDDEN = 128
LANE = 128          # lane width of the padded output block
NEG_BIG = -1e30     # bias for padded logit columns -> exp() underflows to 0
TB_CAP = 2048       # batch-tile cap (sweepable 1024-4096; VMEM-safe everywhere)


def _round_up(n, m):
    return ((n + m - 1) // m) * m


def policy_mlp_kernel(x_ref, w1_ref, b1_ref, w2_ref, b2_ref, w3_ref, b3_ref,
                      out_ref):
    # x arrives f32; cast to bf16 in-kernel (free under DMA/overhead-bound step).
    x = x_ref[...].astype(jnp.bfloat16)

    # fc1 + ReLU (bf16 operands, f32 accumulation)
    h1 = jnp.dot(x, w1_ref[...], preferred_element_type=jnp.float32)
    h1 = jnp.maximum(h1 + b1_ref[...], 0.0)

    # fc2 + ReLU
    h2 = jnp.dot(h1.astype(jnp.bfloat16), w2_ref[...],
                 preferred_element_type=jnp.float32)
    h2 = jnp.maximum(h2 + b2_ref[...], 0.0)

    # fc3 (output columns padded to LANE; padded columns carry bias -1e30)
    logits = jnp.dot(h2.astype(jnp.bfloat16), w3_ref[...],
                     preferred_element_type=jnp.float32)
    logits = logits + b3_ref[...]

    # Numerically stable softmax over the last axis; padded lanes contribute 0.
    # Exact f32 divide so each row sums to 1 (downstream may take log(probs)).
    m = jnp.max(logits, axis=-1, keepdims=True)
    e = jnp.exp(logits - m)
    denom = jnp.sum(e, axis=-1, keepdims=True)
    out_ref[...] = (e / denom).astype(out_ref.dtype)


def prepare_params(params):
    """One-time operand prep (hoisted out of the per-step forward call)."""
    out_dim = params["w3"].shape[1]
    w3_b = jnp.zeros((HIDDEN, LANE), jnp.bfloat16).at[:, :out_dim].set(
        params["w3"].astype(jnp.bfloat16))
    b3_p = jnp.full((1, LANE), NEG_BIG, jnp.float32).at[:, :out_dim].set(
        params["b3"])
    return {
        "w1": params["w1"].astype(jnp.bfloat16), "b1": params["b1"],
        "w2": params["w2"].astype(jnp.bfloat16), "b2": params["b2"],
        "w3": w3_b, "b3": b3_p,
        "out_dim": out_dim,
    }


def policy_network_forward(x, prepared, *, out_dtype=jnp.float32,
                           return_padded=False):
    """x: (B, input_dim) float32.  prepared: output of prepare_params()."""
    B, input_dim = x.shape
    out_dim = prepared["out_dim"]

    # ---- batch tiling ------------------------------------------------------
    # Multiple of 8 (sublane), capped at TB_CAP, and clamped so large batches
    # keep >=2 grid steps (both v7x TensorCores get work via the parallel axis).
    TB = max(8, min(TB_CAP, _round_up(pl.cdiv(B, 2), 8)))
    B_pad = _round_up(B, TB)
    grid = (B_pad // TB,)

    x_p = x if B_pad == B else jnp.pad(x, ((0, B_pad - B), (0, 0)))

    resident = lambda a: pl.BlockSpec(a.shape, lambda i: (0,) * a.ndim)

    out_padded = pl.pallas_call(
        policy_mlp_kernel,
        out_shape=jax.ShapeDtypeStruct((B_pad, LANE), out_dtype),
        grid=grid,
        in_specs=[
            pl.BlockSpec((TB, input_dim), lambda i: (i, 0)),  # x tile
            resident(prepared["w1"]), resident(prepared["b1"]),
            resident(prepared["w2"]), resident(prepared["b2"]),
            resident(prepared["w3"]), resident(prepared["b3"]),
        ],
        out_specs=pl.BlockSpec((TB, LANE), lambda i: (i, 0)),
        compiler_params=pltpu.CompilerParams(
            dimension_semantics=("parallel",)),
    )(x_p, prepared["w1"], prepared["b1"], prepared["w2"], prepared["b2"],
      prepared["w3"], prepared["b3"])

    if return_padded:
        return out_padded          # (B_pad, 128); cols >= out_dim are exactly 0
    return out_padded[:B, :out_dim]


def init_params(key, input_dim, output_dim, hidden=HIDDEN):
    """Deterministic init mirroring nn.Linear default (uniform +-1/sqrt(fan_in))."""
    ks = jax.random.split(key, 6)

    def linear(kw, kb, fan_in, fan_out):
        bound = 1.0 / jnp.sqrt(fan_in)
        w = jax.random.uniform(kw, (fan_in, fan_out), jnp.float32, -bound, bound)
        b = jax.random.uniform(kb, (1, fan_out), jnp.float32, -bound, bound)
        return w, b

    w1, b1 = linear(ks[0], ks[1], input_dim, hidden)
    w2, b2 = linear(ks[2], ks[3], hidden, hidden)
    w3, b3 = linear(ks[4], ks[5], hidden, output_dim)
    return {"w1": w1, "b1": b1, "w2": w2, "b2": b2, "w3": w3, "b3": b3}


def reference_forward(x, params):
    h1 = jnp.maximum(x @ params["w1"] + params["b1"], 0.0)
    h2 = jnp.maximum(h1 @ params["w2"] + params["b2"], 0.0)
    logits = h2 @ params["w3"] + params["b3"]
    return jax.nn.softmax(logits, axis=-1)


if __name__ == "__main__":
    # LunarLander-v2: observation dim 8, action dim 4
    input_dim, output_dim, batch = 8, 4, 2

    key = jax.random.PRNGKey(0)
    k_x, k_p = jax.random.split(key)
    x = jax.random.normal(k_x, (batch, input_dim), dtype=jnp.float32)
    params = init_params(k_p, input_dim, output_dim)

    prepared = prepare_params(params)          # one-time, reused every step
    out = policy_network_forward(x, prepared)
    out = jax.block_until_ready(out)

    ref = reference_forward(x, params)
    assert out.shape == (batch, output_dim)
    # exact f32 softmax normalization -> rows sum to 1 within f32 rounding
    assert jnp.allclose(jnp.sum(out, axis=-1), 1.0, atol=1e-5)
    # bf16 matmul operands (f32 accumulation) -> relaxed tolerance vs f32 ref
    assert jnp.allclose(out, ref, atol=2e-2, rtol=2e-2)

    print("KERNEL_OK")
</pallas_src>

<mosaic_0001>
module attributes {stable_mosaic.version = 11 : i64} {
  func.func @policy_mlp_kernel(%arg0: i32, %arg1: memref<8x8xf32, #tpu.memory_space<vmem>>, %arg2: memref<8x128xbf16, #tpu.memory_space<vmem>>, %arg3: memref<1x128xf32, #tpu.memory_space<vmem>>, %arg4: memref<128x128xbf16, #tpu.memory_space<vmem>>, %arg5: memref<1x128xf32, #tpu.memory_space<vmem>>, %arg6: memref<128x128xbf16, #tpu.memory_space<vmem>>, %arg7: memref<1x128xf32, #tpu.memory_space<vmem>>, %arg8: memref<8x128xf32, #tpu.memory_space<vmem>>) attributes {dimension_semantics = [#tpu.dimension_semantics<parallel>], iteration_bounds = array<i64: 1>, scalar_prefetch = 0 : i64, scratch_operands = 0 : i64, tpu.core_type = #tpu.core_type<tc>, window_params = [{transform_indices = @transform_0, window_bounds = array<i64: 8, 8>}, {pipeline_mode = #tpu.pipeline_mode<synchronous>, transform_indices = @transform_1, window_bounds = array<i64: 8, 128>}, {pipeline_mode = #tpu.pipeline_mode<synchronous>, transform_indices = @transform_2, window_bounds = array<i64: 1, 128>}, {pipeline_mode = #tpu.pipeline_mode<synchronous>, transform_indices = @transform_3, window_bounds = array<i64: 128, 128>}, {pipeline_mode = #tpu.pipeline_mode<synchronous>, transform_indices = @transform_4, window_bounds = array<i64: 1, 128>}, {pipeline_mode = #tpu.pipeline_mode<synchronous>, transform_indices = @transform_5, window_bounds = array<i64: 128, 128>}, {pipeline_mode = #tpu.pipeline_mode<synchronous>, transform_indices = @transform_6, window_bounds = array<i64: 1, 128>}, {transform_indices = @transform_7, window_bounds = array<i64: 8, 128>}]} {
    %c0 = arith.constant 0 : index
    %c0_0 = arith.constant 0 : index
    %0 = vector.load %arg1[%c0, %c0_0] : memref<8x8xf32, #tpu.memory_space<vmem>>, vector<8x8xf32>
    %1 = arith.truncf %0 : vector<8x8xf32> to vector<8x8xbf16>
    %c0_1 = arith.constant 0 : index
    %c0_2 = arith.constant 0 : index
    %2 = vector.load %arg2[%c0_1, %c0_2] : memref<8x128xbf16, #tpu.memory_space<vmem>>, vector<8x128xbf16>
    %cst = arith.constant dense<0.000000e+00> : vector<8x128xf32>
    %3 = tpu.matmul %1, %2, %cst {dimension_numbers = #tpu.dot_dimension_numbers<[1], [0], [0], [1], [0, 0, 1, 1], [], []>} : vector<8x8xbf16>, vector<8x128xbf16>, vector<8x128xf32> -> vector<8x128xf32>
    %c0_3 = arith.constant 0 : index
    %c0_4 = arith.constant 0 : index
    %4 = vector.load %arg3[%c0_3, %c0_4] : memref<1x128xf32, #tpu.memory_space<vmem>>, vector<1x128xf32>
    %5 = vector.broadcast %4 : vector<1x128xf32> to vector<8x128xf32>
    %6 = arith.addf %3, %5 : vector<8x128xf32>
    %cst_5 = arith.constant 0.000000e+00 : f32
    %7 = vector.broadcast %cst_5 : f32 to vector<8x128xf32>
    %8 = arith.maximumf %6, %7 : vector<8x128xf32>
    %9 = arith.truncf %8 : vector<8x128xf32> to vector<8x128xbf16>
    %c0_6 = arith.constant 0 : index
    %c0_7 = arith.constant 0 : index
    %10 = vector.load %arg4[%c0_6, %c0_7] : memref<128x128xbf16, #tpu.memory_space<vmem>>, vector<128x128xbf16>
    %cst_8 = arith.constant dense<0.000000e+00> : vector<8x128xf32>
    %11 = tpu.matmul %9, %10, %cst_8 {dimension_numbers = #tpu.dot_dimension_numbers<[1], [0], [0], [1], [0, 0, 1, 1], [], []>} : vector<8x128xbf16>, vector<128x128xbf16>, vector<8x128xf32> -> vector<8x128xf32>
    %c0_9 = arith.constant 0 : index
    %c0_10 = arith.constant 0 : index
    %12 = vector.load %arg5[%c0_9, %c0_10] : memref<1x128xf32, #tpu.memory_space<vmem>>, vector<1x128xf32>
    %13 = vector.broadcast %12 : vector<1x128xf32> to vector<8x128xf32>
    %14 = arith.addf %11, %13 : vector<8x128xf32>
    %cst_11 = arith.constant 0.000000e+00 : f32
    %15 = vector.broadcast %cst_11 : f32 to vector<8x128xf32>
    %16 = arith.maximumf %14, %15 : vector<8x128xf32>
    %17 = arith.truncf %16 : vector<8x128xf32> to vector<8x128xbf16>
    %c0_12 = arith.constant 0 : index
    %c0_13 = arith.constant 0 : index
    %18 = vector.load %arg6[%c0_12, %c0_13] : memref<128x128xbf16, #tpu.memory_space<vmem>>, vector<128x128xbf16>
    %cst_14 = arith.constant dense<0.000000e+00> : vector<8x128xf32>
    %19 = tpu.matmul %17, %18, %cst_14 {dimension_numbers = #tpu.dot_dimension_numbers<[1], [0], [0], [1], [0, 0, 1, 1], [], []>} : vector<8x128xbf16>, vector<128x128xbf16>, vector<8x128xf32> -> vector<8x128xf32>
    %c0_15 = arith.constant 0 : index
    %c0_16 = arith.constant 0 : index
    %20 = vector.load %arg7[%c0_15, %c0_16] : memref<1x128xf32, #tpu.memory_space<vmem>>, vector<1x128xf32>
    %21 = vector.broadcast %20 : vector<1x128xf32> to vector<8x128xf32>
    %22 = arith.addf %19, %21 : vector<8x128xf32>
    %cst_17 = arith.constant dense<0xFF800000> : vector<8xf32>
    %23 = vector.multi_reduction <maximumf>, %22, %cst_17 [1] : vector<8x128xf32> to vector<8xf32>
    %24 = vector.shape_cast %23 : vector<8xf32> to vector<8x1xf32>
    %25 = vector.broadcast %24 : vector<8x1xf32> to vector<8x128xf32>
    %26 = arith.subf %22, %25 : vector<8x128xf32>
    %27 = math.exp %26 : vector<8x128xf32>
    %cst_18 = arith.constant dense<0.000000e+00> : vector<8xf32>
    %28 = vector.multi_reduction <add>, %27, %cst_18 [1] : vector<8x128xf32> to vector<8xf32>
    %29 = vector.shape_cast %28 : vector<8xf32> to vector<8x1xf32>
    %30 = vector.broadcast %29 : vector<8x1xf32> to vector<8x128xf32>
    %31 = arith.divf %27, %30 : vector<8x128xf32>
    %c0_19 = arith.constant 0 : index
    %c0_20 = arith.constant 0 : index
    %32 = vector.load %arg8[%c0_19, %c0_20] : memref<8x128xf32, #tpu.memory_space<vmem>>, vector<8x128xf32>
    tpu.vector_store %arg8[%c0_19, %c0_20], %31 {strides = array<i32>} : memref<8x128xf32, #tpu.memory_space<vmem>>, vector<8x128xf32>,
    return
  }
  func.func @transform_0(%arg0: i32) -> (i32, i32) {
    %c0_i32 = arith.constant 0 : i32
    %c0_i32_0 = arith.constant 0 : i32
    return %arg0, %c0_i32 : i32, i32
  }
  func.func @transform_1(%arg0: i32) -> (i32, i32) {
    %c0_i32 = arith.constant 0 : i32
    %c0_i32_0 = arith.constant 0 : i32
    %c0_i32_1 = arith.constant 0 : i32
    return %c0_i32, %c0_i32_0 : i32, i32
  }
  func.func @transform_2(%arg0: i32) -> (i32, i32) {
    %c0_i32 = arith.constant 0 : i32
    %c0_i32_0 = arith.constant 0 : i32
    %c0_i32_1 = arith.constant 0 : i32
    return %c0_i32, %c0_i32_0 : i32, i32
  }
  func.func @transform_3(%arg0: i32) -> (i32, i32) {
    %c0_i32 = arith.constant 0 : i32
    %c0_i32_0 = arith.constant 0 : i32
    %c0_i32_1 = arith.constant 0 : i32
    return %c0_i32, %c0_i32_0 : i32, i32
  }
  func.func @transform_4(%arg0: i32) -> (i32, i32) {
    %c0_i32 = arith.constant 0 : i32
    %c0_i32_0 = arith.constant 0 : i32
    %c0_i32_1 = arith.constant 0 : i32
    return %c0_i32, %c0_i32_0 : i32, i32
  }
  func.func @transform_5(%arg0: i32) -> (i32, i32) {
    %c0_i32 = arith.constant 0 : i32
    %c0_i32_0 = arith.constant 0 : i32
    %c0_i32_1 = arith.constant 0 : i32
    return %c0_i32, %c0_i32_0 : i32, i32
  }
  func.func @transform_6(%arg0: i32) -> (i32, i32) {
    %c0_i32 = arith.constant 0 : i32
    %c0_i32_0 = arith.constant 0 : i32
    %c0_i32_1 = arith.constant 0 : i32
    return %c0_i32, %c0_i32_0 : i32, i32
  }
  func.func @transform_7(%arg0: i32) -> (i32, i32) {
    %c0_i32 = arith.constant 0 : i32
    %c0_i32_0 = arith.constant 0 : i32
    return %arg0, %c0_i32 : i32, i32
  }
}

</mosaic_0001>

<bundles_post_ra>
// kernel: tpu_custom_call.1
= control target key start
LH: loop header
LB: loop body
LE: loop exit
PB: predicated region body
PF: predicated region fallthrough
CT: control target
= control target key end

     0   :  { %12 = vsyncpa [#allocation3], 0  ;;  %s709_s0 = inlined_call_operand.hbm [shape: f32[8,8], index: 0, kind: input, shape index: {}]   ;;  %s710_s1 = inlined_call_operand.hbm [shape: bf16[8,128], index: 1, kind: input, shape index: {}]   ;;  %s711_s2 = inlined_call_operand.vmem [shape: f32[1,128], index: 2, kind: input, shape index: {}]   ;;  %s712_s3 = inlined_call_operand.hbm [shape: bf16[128,128], index: 3, kind: input, shape index: {}]   ;;  %s713_s4 = inlined_call_operand.vmem [shape: f32[1,128], index: 4, kind: input, shape index: {}]   ;;  %s714_s5 = inlined_call_operand.hbm [shape: bf16[128,128], index: 5, kind: input, shape index: {}]   ;;  %s715_s6 = inlined_call_operand.vmem [shape: f32[1,128], index: 6, kind: input, shape index: {}]   ;;  %s716_s7 = inlined_call_operand.hbm [shape: f32[8,128], index: 7, kind: output, shape index: {}]  }
   0x1   :  { %13 = vsyncpa [#allocation6], 0 }
   0x2   :  { %14 = vsyncpa [#allocation9], 0 }
   0x3   :  { %15 = vsyncpa [#allocation4], 0  ;;  %s613_s24 = smov [#allocation5]   ;;  %s614_s26 = smov [#allocation2]  }
   0x4   :  { %s32_s25 = sshll.u32 %s613_s24, 4  ;;  %s22_s27 = sshll.u32 %s614_s26, 4  ;;  %s33_s25 = int_to_ptr.vmem [resolvable:$true] %s32_s25  ;;  %s23_s27 = int_to_ptr.vmem [resolvable:$true] %s22_s27 }
   0x5   :  { %s513_s28 = scalar_lea.vmem %s33_s25, 64  ;;  %p518_p1 = scmp.lt.s32.totalorder %s33_s25, %s33_s25 }
   0x6   :  { %p514_p0 = scmp.ne.s32.totalorder %s33_s25, %s513_s28  ;;  %p519_p2 = scmp.lt.s32.totalorder %s513_s28, %s513_s28 }
   0x8   :  { %p520_p3 = por %p519_p2, %p518_p1 }
   0xa   :  { %p521_p4 = pnand %p520_p3, %p514_p0 }
   0xc   :  { %524 = shalt.err (!%p521_p4)
}
   0xd   :  { %35 = dma.hbm_to_vmem [thread:$0]  %s710_s1, 64, %s33_s25, [#allocation6]  }
   0xe   :  { %s533_s8 = scalar_lea.vmem %s23_s27, 128  ;;  %p538_p6 = scmp.lt.s32.totalorder %s23_s27, %s23_s27 }
   0xf   :  { %p534_p5 = scmp.ne.s32.totalorder %s23_s27, %s533_s8  ;;  %p539_p7 = scmp.lt.s32.totalorder %s533_s8, %s533_s8 }
  0x11   :  { %p540_p8 = por %p539_p7, %p538_p6 }
  0x13   :  { %p541_p9 = pnand %p540_p8, %p534_p5 }
  0x15   :  { %544 = shalt.err (!%p541_p9)
}
  0x16   :  { %25 = dma.hbm_to_vmem [thread:$0]  %s709_s0, 128, %s23_s27, [#allocation3]  }
  0x17   :  { %s615_s11 = smov [#allocation7]  }
  0x18   :  { %s43_s12 = sshll.u32 %s615_s11, 4  ;;  %s44_s12 = int_to_ptr.vmem [resolvable:$true] %s43_s12 }
  0x19   :  { %s553_s13 = scalar_lea.vmem %s44_s12, 1024  ;;  %p558_p11 = scmp.lt.s32.totalorder %s44_s12, %s44_s12 }
  0x1a   :  { %p554_p10 = scmp.ne.s32.totalorder %s44_s12, %s553_s13  ;;  %p559_p12 = scmp.lt.s32.totalorder %s553_s13, %s553_s13 }
  0x1c   :  { %p560_p13 = por %p559_p12, %p558_p11 }
  0x1e   :  { %p561_p0 = pnand %p560_p13, %p554_p10 }
  0x20   :  { %564 = shalt.err (!%p561_p0)
}
  0x21   :  { %s616_s1 = smov 64   ;;  %s617_s14 = smov 4  }
  0x22   :  { %49 = dma.hbm_to_vmem [thread:$0]  %s712_s3, 1024, %s44_s12, [#allocation6], %s616_s1, %s616_s1, %s617_s14  }
  0x23   :  { %s618_s17 = smov [#allocation8]  }
  0x24   :  { %s57_s18 = sshll.u32 %s618_s17, 4  ;;  %s58_s18 = int_to_ptr.vmem [resolvable:$true] %s57_s18 }
  0x25   :  { %s573_s0 = scalar_lea.vmem %s58_s18, 1024  ;;  %p578_p2 = scmp.lt.s32.totalorder %s58_s18, %s58_s18 }
  0x26   :  { %p574_p1 = scmp.ne.s32.totalorder %s58_s18, %s573_s0  ;;  %p579_p3 = scmp.lt.s32.totalorder %s573_s0, %s573_s0 }
  0x28   :  { %p580_p4 = por %p579_p3, %p578_p2 }
  0x2a   :  { %p581_p5 = pnand %p580_p4, %p574_p1 }
  0x2c   :  { %584 = shalt.err (!%p581_p5)
}
  0x2d   :  { %63 = dma.hbm_to_vmem [thread:$0]  %s714_s5, 1024, %s58_s18, [#allocation9], %s616_s1, %s616_s1, %s617_s14  }
  0x2e   :  { %605 = dma.done.wait [#allocation3], 128  }
  0x2f   :  { %606 = vsyncadd [#allocation3], 4294967168 }
  0x30   :  { %607 = dma.done.wait [#allocation6], 1088  }
  0x31   :  { %608 = vsyncadd [#allocation6], 4294966208 }
  0x32   :  { %609 = dma.done.wait [#allocation9], 1024  }
  0x33   :  { %610 = vsyncadd [#allocation9], 4294966272  ;;  %v619_v0 = vmov 0.0   ;;  %vm620_vm0 = vmmov 0   ;;  %vm93_vm1 = vcmask 1043456   ;;  %v79_v2 = vld [vmem:[#allocation2] sm:$0xff] }
  0x34   :  { %430 = vmatprep.subr.bf16.mxu0 %v619_v0  ;;  %432 = vmatprep.mubr.msk.bf16.mxu0 %vm620_vm0, %v619_v0  ;;  %v81_v1 = vld [vmem:[#allocation5] sm:$0xf]  ;;  %v80_v4 = vpack.c.bf16 %v79_v2, %v79_v2  ;;  %vm89_vm2 = vcmask 64512   ;;  %v486_v6 = vld [vmem:[#allocation7 + $0x30] sm:$0xff]   ;;  %v487_v7 = vld [vmem:[#allocation7 + $0x28] sm:$0xff]  }
  0x35   :  { %436 = vmatprep.subr.bf16.mxu1 %v619_v0  ;;  %452 = vmatprep.mubr.msk.bf16.mxu1 %vm620_vm0, %v619_v0  ;;  %v95_v3 = vsel %vm93_vm1, %v81_v1, 0  ;;  %v485_v5 = vld [vmem:[#allocation7 + $0x38] sm:$0xff]   ;;  %v488_v8 = vld [vmem:[#allocation7 + $0x20] sm:$0xff]   ;;  %v490_v10 = vld [vmem:[#allocation7 + $0x10] sm:$0xff]  }
  0x36   :  { %431 = vmatpush3.bf16.msra.mxu0 %v95_v3  ;;  %437 = vmatpush3.bf16.msra.mxu1 %v485_v5  ;;  %v489_v9 = vld [vmem:[#allocation7 + $0x18] sm:$0xff]   ;;  %v491_v11 = vld [vmem:[#allocation7 + $0x8] sm:$0xff]   ;;  %v492_v12 = vld [vmem:[#allocation7] sm:$0xff]  }
  0x37   :  { %456 = vmatprep.subr.bf16.mxu0 %v619_v0  ;;  %438 = vmatprep.subr.bf16.mxu1 %v619_v0  ;;  %v493_v13 = vld [vmem:[#allocation8 + $0x38] sm:$0xff]   ;;  %v494_v14 = vld [vmem:[#allocation8 + $0x30] sm:$0xff]   ;;  %v495_v15 = vld [vmem:[#allocation8 + $0x28] sm:$0xff]  }
  0x38   :  { %v496_v16 = vld [vmem:[#allocation8 + $0x20] sm:$0xff]   ;;  %v497_v17 = vld [vmem:[#allocation8 + $0x18] sm:$0xff]   ;;  %v498_v18 = vld [vmem:[#allocation8 + $0x10] sm:$0xff]  }
  0x39   :  { %433 = vmatmul.mubr.msk.bf16.vlgmr.msra.gmra.mxu0 %vm89_vm2, %v80_v4  ;;  %v390_v19 = vld [vmem:[%s711_s2] ss:$0 sm:$0xff]  ;;  %v499_v27 = vld [vmem:[#allocation8 + $0x8] sm:$0xff]   ;;  %v500_v28 = vld [vmem:[#allocation8] sm:$0xff]  }
  0x3a   :  { %472 = vmatprep.mubr.msk.bf16.mxu0 %vm620_vm0, %v619_v0  ;;  %439 = vmatpush3.bf16.msra.mxu1 %v486_v6  ;;  %v392_v29 = vld [vmem:[%s713_s4] ss:$0 sm:$0xff]  ;;  %s621_s4 = smov [#allocation10]  }
  0x3b   :  { %440 = vmatprep.subr.bf16.mxu1 %v619_v0  ;;  %457 = vmatpush3.bf16.msra.mxu0 %v493_v13  ;;  %v401_v37 = vld [vmem:[%s715_s6] ss:$0 sm:$0xff]  ;;  %s379_s24 = sshll.u32 %s621_s4, 4  ;;  %s380_s24 = int_to_ptr.vmem [resolvable:$true] %s379_s24 }
  0x3c   :  { %458 = vmatprep.subr.bf16.mxu0 %v619_v0  ;;  %s585_s6 = scalar_lea.vmem %s380_s24, 128  ;;  %p590_p7 = scmp.lt.s32.totalorder %s380_s24, %s380_s24 }
  0x3d   :  { %p586_p6 = scmp.ne.s32.totalorder %s380_s24, %s585_s6  ;;  %p591_p8 = scmp.lt.s32.totalorder %s585_s6, %s585_s6 }
  0x3e   :  { %441 = vmatpush3.bf16.msra.mxu1 %v487_v7 }
  0x3f   :  { %442 = vmatprep.subr.bf16.mxu1 %v619_v0  ;;  %459 = vmatpush3.bf16.msra.mxu0 %v494_v14  ;;  %p592_p9 = por %p591_p8, %p590_p7 }
  0x40   :  { %460 = vmatprep.subr.bf16.mxu0 %v619_v0 }
  0x41   :  { %p593_p10 = pnand %p592_p9, %p586_p6 }
  0x42   :  { %443 = vmatpush3.bf16.msra.mxu1 %v488_v8 }
  0x43   :  { %444 = vmatprep.subr.bf16.mxu1 %v619_v0  ;;  %461 = vmatpush3.bf16.msra.mxu0 %v495_v15 }
  0x44   :  { %462 = vmatprep.subr.bf16.mxu0 %v619_v0 }
  0x46   :  { %445 = vmatpush3.bf16.msra.mxu1 %v489_v9 }
  0x47   :  { %446 = vmatprep.subr.bf16.mxu1 %v619_v0  ;;  %463 = vmatpush3.bf16.msra.mxu0 %v496_v16 }
  0x48   :  { %464 = vmatprep.subr.bf16.mxu0 %v619_v0 }
  0x4a   :  { %447 = vmatpush3.bf16.msra.mxu1 %v490_v10 }
  0x4b   :  { %448 = vmatprep.subr.bf16.mxu1 %v619_v0  ;;  %465 = vmatpush3.bf16.msra.mxu0 %v497_v17 }
  0x4c   :  { %466 = vmatprep.subr.bf16.mxu0 %v619_v0 }
  0x4e   :  { %449 = vmatpush3.bf16.msra.mxu1 %v491_v11 }
  0x4f   :  { %450 = vmatprep.subr.bf16.mxu1 %v619_v0  ;;  %467 = vmatpush3.bf16.msra.mxu0 %v498_v18 }
  0x50   :  { %468 = vmatprep.subr.bf16.mxu0 %v619_v0 }
  0x52   :  { %451 = vmatpush3.bf16.msra.mxu1 %v492_v12 }
  0x53   :  { %469 = vmatpush3.bf16.msra.mxu0 %v499_v27 }
  0x54   :  { %470 = vmatprep.subr.bf16.mxu0 %v619_v0 }
  0x57   :  { %471 = vmatpush3.bf16.msra.mxu0 %v500_v28 }
  0xf9   :  { %v131_v20 = vpop.f32.mrf.mxu0 }
  0xfa   :  { %v132_v21 = vadd.f32 %v390_v19, %v131_v20 }
  0xfb   :  { %v434_v22 = vpop.f32.mrf.mxu0 }
  0xfc   :  { %v137_v23 = vmax.f32 %v132_v21, 0.0 }
  0xfd   :  { %v134_v24 = vpop.f32.mrf.mxu0 }
  0xfe   :  { %v138_v25 = vpack.c.bf16 %v137_v23, %v137_v23 }
  0xff   :  { %v435_v26 = vpop.f32.mrf.mxu0 }
 0x100   :  { %453 = vmatmul.mubr.bf16.vlgmr.msra.gmra.mxu1 %v138_v25 }
 0x1c0   :  { %v244_v30 = vpop.f32.mrf.mxu1 }
 0x1c1   :  { %v245_v31 = vadd.f32 %v392_v29, %v244_v30 }
 0x1c2   :  { %v454_v32 = vpop.f32.mrf.mxu1 }
 0x1c3   :  { %v250_v33 = vmax.f32 %v245_v31, 0.0 }
 0x1c4   :  { %v247_v34 = vpop.f32.mrf.mxu1 }
 0x1c5   :  { %v251_v35 = vpack.c.bf16 %v250_v33, %v250_v33 }
 0x1c6   :  { %v455_v36 = vpop.f32.mrf.mxu1 }
 0x1c7   :  { %473 = vmatmul.mubr.bf16.vlgmr.msra.gmra.mxu0 %v251_v35 }
 0x287   :  { %v357_v38 = vpop.f32.mrf.mxu0 }
 0x288   :  { %v358_v39 = vadd.f32 %v401_v37, %v357_v38 }
 0x289   :  { %v474_v40 = vpop.f32.mrf.mxu0 }
 0x28a   :  { %363 = vmax.xlane.f32.xlu0 %v358_v39 }
 0x28b   :  { %v360_v41 = vpop.f32.mrf.mxu0 }
 0x28d   :  { %v475_v42 = vpop.f32.mrf.mxu0 }
 0x313   :  { %v364_v43 = vpop.xlane.xlu0 %363 }
 0x314   :  { %v365_v44 = vsub.f32 %v358_v39, %v364_v43 }
 0x316   :  { %v366_v45 = vmul.f32 1.442695, %v365_v44 }
 0x318   :  { %501 = vpow2.f32 %v366_v45 }
 0x325   :  { %v502_v46 = vpop.eup %501 }
 0x326   :  { %368 = vadd.xlane.f32.xlu0 %v502_v46 }
 0x3af   :  { %v369_v47 = vpop.xlane.xlu0 %368 }
 0x3b0   :  { %503 = vrcp.f32 %v369_v47 }
 0x3bd   :  { %v504_v48 = vpop.eup %503 }
 0x3be   :  { %v371_v49 = vmul.f32 %v504_v48, %v502_v46 }
 0x3c0   :  { %372 = vst [vmem:[#allocation10] sm:$0xff] %v371_v49 }
 0x3c1   :  { %596 = shalt.err (!%p593_p10)
}
 0x3c2   :  { %382 = dma.vmem_to_hbm [thread:$0]  %s380_s24, 128, %s716_s7, [#allocation4]  }
 0x3c3   :  { %611 = dma.done.wait [#allocation4], 128  }
 0x3c4   :  { %612 = vsyncadd [#allocation4], 4294967168 }
 0x3c5   :  { %386 = vsyncpa [#allocation3], 1 }
 0x3c6   :  { %387 = vsyncpa [#allocation6], 1 }
 0x3c7   :  { %388 = vsyncpa [#allocation9], 1 }
 0x3c8   :  { %389 = vsyncpa [#allocation4], 1 }

</bundles_post_ra>
